<compile_context>
chip_gen: v5e
topology: v5e:2x2
jax: 0.10.0
libtpu: 0.0.40
codegen_flags: <defaults>
</compile_context>

<pallas_src>
import functools

import jax
import jax.numpy as jnp
from jax import lax
from jax.experimental import pallas as pl
from jax.experimental.pallas import tpu as pltpu


def _flash_attn_kernel(q_ref, k_ref, v_ref, o_ref, m_ref, l_ref, acc_ref, *,
                       scale, causal, tq, tkv):
    # q_ref: (1, TQ, 1, G, D)  k_ref/v_ref: (1, TKV, 1, G, D)
    # o_ref: (1, TQ, G, D)
    # m_ref/l_ref: (G, TQ, 1) f32   acc_ref: (G, TQ, D) f32
    G = q_ref.shape[3]
    v_dtype = v_ref.dtype

    kv = pl.program_id(3)
    num_kv = pl.num_programs(3)
    q_start = pl.program_id(2) * tq
    kv_start = kv * tkv

    @pl.when(kv == 0)
    def _init():
        m_ref[...] = jnp.full(m_ref.shape, -jnp.inf, jnp.float32)
        l_ref[...] = jnp.zeros(l_ref.shape, jnp.float32)
        acc_ref[...] = jnp.zeros(acc_ref.shape, jnp.float32)

    def compute():
        if causal:
            # Hoisted out of the head loop (broadcasts are not CSE'd by JAX).
            row = q_start + lax.broadcasted_iota(jnp.int32, (tq, tkv), 0)
            col = kv_start + lax.broadcasted_iota(jnp.int32, (tq, tkv), 1)
            causal_bias = jnp.where(col > row, jnp.float32(-10000.0),
                                    jnp.float32(0.0))

        for g in range(G):  # G is a small compile-time constant (<= 8/16)
            q = q_ref[0, :, 0, g, :]      # (TQ,  D), input dtype
            k = k_ref[0, :, 0, g, :]      # (TKV, D), input dtype
            v = v_ref[0, :, 0, g, :]      # (TKV, D), input dtype

            # scores[t, s] = sum_d q[t, d] * k[s, d]; MXU accumulates in f32,
            # scale folded into the f32 result (no upcast of q/k).
            s = lax.dot_general(
                q, k,
                dimension_numbers=(((1,), (1,)), ((), ())),
                preferred_element_type=jnp.float32,
            ) * jnp.float32(scale)                      # (TQ, TKV) f32

            if causal:
                s = s + causal_bias

            # Online softmax update (all f32 arithmetic; no dtype round trip).
            m_prev = m_ref[g]                            # (TQ, 1)
            m_new = jnp.maximum(m_prev, jnp.max(s, axis=-1, keepdims=True))
            alpha = jnp.exp(m_prev - m_new)
            p = jnp.exp(s - m_new)                       # (TQ, TKV) f32
            l_ref[g] = alpha * l_ref[g] + jnp.sum(p, axis=-1, keepdims=True)
            acc_ref[g] = alpha * acc_ref[g] + jnp.dot(
                p.astype(v_dtype), v, preferred_element_type=jnp.float32)
            m_ref[g] = m_new

        # TODO(synk): attention_dropout is 0.0 (identity); nonzero training
        # dropout would need pltpu.prng_* inside the kernel.

    if causal:
        # Skip KV tiles that are entirely above the diagonal for this q tile
        # (exp(-10000 + x) underflows to 0, so skipping is numerically exact).
        @pl.when(kv_start <= q_start + tq - 1)
        def _():
            compute()
    else:
        compute()

    @pl.when(kv == num_kv - 1)
    def _store():
        for g in range(G):
            inv_l = pl.reciprocal(l_ref[g], approx=True)   # EUP slot
            o_ref[0, :, g, :] = (acc_ref[g] * inv_l).astype(o_ref.dtype)


def _pick_tile(s, cap):
    """Largest power-of-two divisor of s that is <= cap (floor 8), else s."""
    t = cap
    while t >= 8:
        if t <= s and s % t == 0:
            return t
        t //= 2
    return s


def _device_kind():
    try:
        return jax.devices()[0].device_kind.lower()
    except Exception:
        return ""


def _vmem_limit_bytes(kind):
    cap = None
    try:
        cap = int(pltpu.get_tpu_info().vmem_capacity_bytes)
    except Exception:
        cap = None
    if ("v7" in kind) or ("7x" in kind):
        cap = min(cap or (64 << 20), 64 << 20)      # v7x: 64 MiB per TC
    elif not cap:
        cap = 128 << 20                             # v5e / v6e physical VMEM
    return max(min(int(cap * 0.78), 100 << 20), 32 << 20)


def self_attention(qkv, *, causal=False, softmax_scale=None,
                   q_tile=None, kv_tile=None):
    """qkv: (B, S, 3, H, D). Returns (B, S, H, D), matching torch 'bthd'."""
    B, S, three, H, D = qkv.shape
    assert three == 3
    # Matches torch's `self.softmax_scale or d**-0.5` (0.0 treated as unset).
    scale = softmax_scale or float(D) ** (-0.5)

    # Head-group size G: H is the second-minor dim of the qkv blocks, so it
    # must be a sublane multiple (8/16/32 for 4/2/1-byte dtypes) or the full H.
    itemsize = jnp.dtype(qkv.dtype).itemsize
    sub = {4: 8, 2: 16, 1: 32}.get(itemsize, 8)
    G = sub if (H % sub == 0) else H

    kind = _device_kind()
    is_v5e = ("v5 lite" in kind) or ("v5e" in kind) or ("v5litepod" in kind)

    # Query tile: matches the MXU M dimension (256 on v6e/v7x, 128 on v5e).
    tq_cap = q_tile if q_tile is not None else (128 if is_v5e else 256)
    # KV tile: bounds VMEM independent of S and keeps the f32 score tile small.
    tkv_cap = kv_tile if kv_tile is not None else 512
    TQ = _pick_tile(S, tq_cap)
    TKV = _pick_tile(S, tkv_cap)

    grid = (B, H // G, S // TQ, S // TKV)   # kv innermost ("arbitrary")

    # qkv is passed three times; BlockSpecs carve q/k/v out of the "3" axis,
    # so no wrapper transposes or splits are needed.
    q_spec = pl.BlockSpec((1, TQ, 1, G, D), lambda b, hg, qi, ki: (b, qi, 0, hg, 0))
    k_spec = pl.BlockSpec((1, TKV, 1, G, D), lambda b, hg, qi, ki: (b, ki, 1, hg, 0))
    v_spec = pl.BlockSpec((1, TKV, 1, G, D), lambda b, hg, qi, ki: (b, ki, 2, hg, 0))
    o_spec = pl.BlockSpec((1, TQ, G, D), lambda b, hg, qi, ki: (b, qi, hg, 0))

    kernel = functools.partial(_flash_attn_kernel, scale=scale, causal=causal,
                               tq=TQ, tkv=TKV)

    return pl.pallas_call(
        kernel,
        out_shape=jax.ShapeDtypeStruct((B, S, H, D), qkv.dtype),
        grid_spec=pltpu.PrefetchScalarGridSpec(
            num_scalar_prefetch=0,
            grid=grid,
            in_specs=[q_spec, k_spec, v_spec],
            out_specs=o_spec,
            scratch_shapes=[
                pltpu.VMEM((G, TQ, 1), jnp.float32),   # running max
                pltpu.VMEM((G, TQ, 1), jnp.float32),   # running denom
                pltpu.VMEM((G, TQ, D), jnp.float32),   # running accumulator
            ],
        ),
        compiler_params=pltpu.CompilerParams(
            # q-tile axis is also parallel (no cross-iteration carry) so v7x's
            # two TensorCores get work even when B * (H // G) < 2.
            dimension_semantics=("parallel", "parallel", "parallel", "arbitrary"),
            vmem_limit_bytes=_vmem_limit_bytes(kind),
        ),
    )(qkv, qkv, qkv)


def _reference(qkv, *, causal=False, softmax_scale=None):
    """Pure-JAX reference mirroring the torch code line-by-line."""
    B, S, _, H, D = qkv.shape
    q, k, v = qkv[:, :, 0], qkv[:, :, 1], qkv[:, :, 2]
    scale = softmax_scale or float(D) ** (-0.5)
    scores = jnp.einsum("bthd,bshd->bhts", q, k * scale)
    if causal:
        mask = jnp.triu(jnp.full((S, S), -10000.0, dtype=scores.dtype), 1)
        scores = scores + mask
    attn = jax.nn.softmax(scores.astype(v.dtype), axis=-1)
    return jnp.einsum("bhts,bshd->bthd", attn, v)


if __name__ == "__main__":
    key = jax.random.PRNGKey(0)

    # Small shape (single q/kv tile path).
    B, S, H, D = 2, 8, 2, 32
    qkv = jax.random.normal(key, (B, S, 3, H, D), dtype=jnp.float32)
    for causal in (False, True):
        out = jax.block_until_ready(self_attention(qkv, causal=causal))
        ref = _reference(qkv, causal=causal)
        assert out.shape == (B, S, H, D)
        assert jnp.allclose(out, ref, atol=2e-3, rtol=2e-3), \
            f"mismatch vs reference (causal={causal})"

    # Multi-tile path: exercises the online-softmax accumulation across KV
    # tiles, multiple q tiles, and causal tile skipping.
    S2 = 32
    qkv2 = jax.random.normal(jax.random.PRNGKey(1), (B, S2, 3, H, D),
                             dtype=jnp.float32)
    for causal in (False, True):
        out = jax.block_until_ready(
            self_attention(qkv2, causal=causal, q_tile=8, kv_tile=8))
        ref = _reference(qkv2, causal=causal)
        assert out.shape == (B, S2, H, D)
        assert jnp.allclose(out, ref, atol=2e-3, rtol=2e-3), \
            f"mismatch vs reference multi-tile (causal={causal})"

    print("KERNEL_OK")
</pallas_src>

<mosaic_0001>
module attributes {stable_mosaic.version = 11 : i64} {
  func.func @_flash_attn_kernel(%arg0: i32, %arg1: i32, %arg2: i32, %arg3: i32, %arg4: memref<1x8x1x2x32xf32, #tpu.memory_space<vmem>>, %arg5: memref<1x8x1x2x32xf32, #tpu.memory_space<vmem>>, %arg6: memref<1x8x1x2x32xf32, #tpu.memory_space<vmem>>, %arg7: memref<1x8x2x32xf32, #tpu.memory_space<vmem>>, %arg8: memref<2x8x1xf32, #tpu.memory_space<vmem>>, %arg9: memref<2x8x1xf32, #tpu.memory_space<vmem>>, %arg10: memref<2x8x32xf32, #tpu.memory_space<vmem>>) attributes {dimension_semantics = [#tpu.dimension_semantics<parallel>, #tpu.dimension_semantics<parallel>, #tpu.dimension_semantics<parallel>, #tpu.dimension_semantics<arbitrary>], iteration_bounds = array<i64: 2, 1, 1, 1>, scalar_prefetch = 0 : i64, scratch_operands = 3 : i64, tpu.core_type = #tpu.core_type<tc>, window_params = [{transform_indices = @transform_0, window_bounds = array<i64: 1, 8, 1, 2, 32>}, {transform_indices = @transform_1, window_bounds = array<i64: 1, 8, 1, 2, 32>}, {transform_indices = @transform_2, window_bounds = array<i64: 1, 8, 1, 2, 32>}, {transform_indices = @transform_3, window_bounds = array<i64: 1, 8, 2, 32>}]} {
    %c0_i32 = arith.constant 0 : i32
    %0 = arith.cmpi eq, %arg3, %c0_i32 : i32
    %1 = arith.extui %0 : i1 to i32
    %c0_i32_0 = arith.constant 0 : i32
    %2 = arith.cmpi ne, %1, %c0_i32_0 : i32
    scf.if %2 {
      %cst_76 = arith.constant 0xFF800000 : f32
      %86 = vector.broadcast %cst_76 : f32 to vector<2x8x1xf32>
      %c0_77 = arith.constant 0 : index
      %c0_78 = arith.constant 0 : index
      %c0_79 = arith.constant 0 : index
      %87 = vector.load %arg8[%c0_77, %c0_78, %c0_79] : memref<2x8x1xf32, #tpu.memory_space<vmem>>, vector<2x8x1xf32>
      tpu.vector_store %arg8[%c0_77, %c0_78, %c0_79], %86 {strides = array<i32>} : memref<2x8x1xf32, #tpu.memory_space<vmem>>, vector<2x8x1xf32>,
      %cst_80 = arith.constant 0.000000e+00 : f32
      %88 = vector.broadcast %cst_80 : f32 to vector<2x8x1xf32>
      %c0_81 = arith.constant 0 : index
      %c0_82 = arith.constant 0 : index
      %c0_83 = arith.constant 0 : index
      %89 = vector.load %arg9[%c0_81, %c0_82, %c0_83] : memref<2x8x1xf32, #tpu.memory_space<vmem>>, vector<2x8x1xf32>
      tpu.vector_store %arg9[%c0_81, %c0_82, %c0_83], %88 {strides = array<i32>} : memref<2x8x1xf32, #tpu.memory_space<vmem>>, vector<2x8x1xf32>,
      %cst_84 = arith.constant 0.000000e+00 : f32
      %90 = vector.broadcast %cst_84 : f32 to vector<2x8x32xf32>
      %c0_85 = arith.constant 0 : index
      %c0_86 = arith.constant 0 : index
      %c0_87 = arith.constant 0 : index
      %91 = vector.load %arg10[%c0_85, %c0_86, %c0_87] : memref<2x8x32xf32, #tpu.memory_space<vmem>>, vector<2x8x32xf32>
      tpu.vector_store %arg10[%c0_85, %c0_86, %c0_87], %90 {strides = array<i32>} : memref<2x8x32xf32, #tpu.memory_space<vmem>>, vector<2x8x32xf32>,
    } else {
    }
    %c0 = arith.constant 0 : index
    %c0_1 = arith.constant 0 : index
    %c0_2 = arith.constant 0 : index
    %c0_3 = arith.constant 0 : index
    %c0_4 = arith.constant 0 : index
    %3 = vector.load %arg4[%c0, %c0_1, %c0_2, %c0_3, %c0_4] : memref<1x8x1x2x32xf32, #tpu.memory_space<vmem>>, vector<1x8x1x1x32xf32>
    %4 = vector.shape_cast %3 : vector<1x8x1x1x32xf32> to vector<8x32xf32>
    %c0_5 = arith.constant 0 : index
    %c0_6 = arith.constant 0 : index
    %c0_7 = arith.constant 0 : index
    %c0_8 = arith.constant 0 : index
    %c0_9 = arith.constant 0 : index
    %5 = vector.load %arg5[%c0_5, %c0_6, %c0_7, %c0_8, %c0_9] : memref<1x8x1x2x32xf32, #tpu.memory_space<vmem>>, vector<1x8x1x1x32xf32>
    %6 = vector.shape_cast %5 : vector<1x8x1x1x32xf32> to vector<8x32xf32>
    %c0_10 = arith.constant 0 : index
    %c0_11 = arith.constant 0 : index
    %c0_12 = arith.constant 0 : index
    %c0_13 = arith.constant 0 : index
    %c0_14 = arith.constant 0 : index
    %7 = vector.load %arg6[%c0_10, %c0_11, %c0_12, %c0_13, %c0_14] : memref<1x8x1x2x32xf32, #tpu.memory_space<vmem>>, vector<1x8x1x1x32xf32>
    %8 = vector.shape_cast %7 : vector<1x8x1x1x32xf32> to vector<8x32xf32>
    %cst = arith.constant dense<0.000000e+00> : vector<8x8xf32>
    %9 = tpu.matmul %4, %6, %cst {dimension_numbers = #tpu.dot_dimension_numbers<[1], [1], [0], [0], [0, 0, 1, 0], [], []>} : vector<8x32xf32>, vector<8x32xf32>, vector<8x8xf32> -> vector<8x8xf32>
    %cst_15 = arith.constant 0.176776692 : f32
    %10 = vector.broadcast %cst_15 : f32 to vector<8x8xf32>
    %11 = arith.mulf %9, %10 : vector<8x8xf32>
    %c0_16 = arith.constant 0 : index
    %c0_17 = arith.constant 0 : index
    %c0_18 = arith.constant 0 : index
    %12 = vector.load %arg8[%c0_16, %c0_17, %c0_18] : memref<2x8x1xf32, #tpu.memory_space<vmem>>, vector<1x8x1xf32>
    %13 = vector.shape_cast %12 : vector<1x8x1xf32> to vector<8x1xf32>
    %cst_19 = arith.constant dense<0xFF800000> : vector<8xf32>
    %14 = vector.multi_reduction <maximumf>, %11, %cst_19 [1] : vector<8x8xf32> to vector<8xf32>
    %15 = vector.shape_cast %14 : vector<8xf32> to vector<8x1xf32>
    %16 = arith.maximumf %13, %15 : vector<8x1xf32>
    %17 = arith.subf %13, %16 : vector<8x1xf32>
    %18 = math.exp %17 : vector<8x1xf32>
    %19 = vector.broadcast %16 : vector<8x1xf32> to vector<8x8xf32>
    %20 = arith.subf %11, %19 : vector<8x8xf32>
    %21 = math.exp %20 : vector<8x8xf32>
    %c0_20 = arith.constant 0 : index
    %c0_21 = arith.constant 0 : index
    %c0_22 = arith.constant 0 : index
    %22 = vector.load %arg9[%c0_20, %c0_21, %c0_22] : memref<2x8x1xf32, #tpu.memory_space<vmem>>, vector<1x8x1xf32>
    %23 = vector.shape_cast %22 : vector<1x8x1xf32> to vector<8x1xf32>
    %24 = arith.mulf %18, %23 : vector<8x1xf32>
    %cst_23 = arith.constant dense<0.000000e+00> : vector<8xf32>
    %25 = vector.multi_reduction <add>, %21, %cst_23 [1] : vector<8x8xf32> to vector<8xf32>
    %26 = vector.shape_cast %25 : vector<8xf32> to vector<8x1xf32>
    %27 = arith.addf %24, %26 : vector<8x1xf32>
    %c0_24 = arith.constant 0 : index
    %c0_25 = arith.constant 0 : index
    %c0_26 = arith.constant 0 : index
    %28 = vector.load %arg9[%c0_24, %c0_25, %c0_26] : memref<2x8x1xf32, #tpu.memory_space<vmem>>, vector<1x8x1xf32>
    %29 = vector.shape_cast %28 : vector<1x8x1xf32> to vector<8x1xf32>
    %30 = vector.shape_cast %27 : vector<8x1xf32> to vector<1x8x1xf32>
    tpu.vector_store %arg9[%c0_24, %c0_25, %c0_26], %30 {strides = array<i32>} : memref<2x8x1xf32, #tpu.memory_space<vmem>>, vector<1x8x1xf32>,
    %c0_27 = arith.constant 0 : index
    %c0_28 = arith.constant 0 : index
    %c0_29 = arith.constant 0 : index
    %31 = vector.load %arg10[%c0_27, %c0_28, %c0_29] : memref<2x8x32xf32, #tpu.memory_space<vmem>>, vector<1x8x32xf32>
    %32 = vector.shape_cast %31 : vector<1x8x32xf32> to vector<8x32xf32>
    %33 = vector.broadcast %18 : vector<8x1xf32> to vector<8x32xf32>
    %34 = arith.mulf %33, %32 : vector<8x32xf32>
    %cst_30 = arith.constant dense<0.000000e+00> : vector<8x32xf32>
    %35 = tpu.matmul %21, %8, %cst_30 {dimension_numbers = #tpu.dot_dimension_numbers<[1], [0], [0], [1], [0, 0, 1, 1], [], []>} : vector<8x8xf32>, vector<8x32xf32>, vector<8x32xf32> -> vector<8x32xf32>
    %36 = arith.addf %34, %35 : vector<8x32xf32>
    %c0_31 = arith.constant 0 : index
    %c0_32 = arith.constant 0 : index
    %c0_33 = arith.constant 0 : index
    %37 = vector.load %arg10[%c0_31, %c0_32, %c0_33] : memref<2x8x32xf32, #tpu.memory_space<vmem>>, vector<1x8x32xf32>
    %38 = vector.shape_cast %37 : vector<1x8x32xf32> to vector<8x32xf32>
    %39 = vector.shape_cast %36 : vector<8x32xf32> to vector<1x8x32xf32>
    tpu.vector_store %arg10[%c0_31, %c0_32, %c0_33], %39 {strides = array<i32>} : memref<2x8x32xf32, #tpu.memory_space<vmem>>, vector<1x8x32xf32>,
    %c0_34 = arith.constant 0 : index
    %c0_35 = arith.constant 0 : index
    %c0_36 = arith.constant 0 : index
    %40 = vector.load %arg8[%c0_34, %c0_35, %c0_36] : memref<2x8x1xf32, #tpu.memory_space<vmem>>, vector<1x8x1xf32>
    %41 = vector.shape_cast %40 : vector<1x8x1xf32> to vector<8x1xf32>
    %42 = vector.shape_cast %16 : vector<8x1xf32> to vector<1x8x1xf32>
    tpu.vector_store %arg8[%c0_34, %c0_35, %c0_36], %42 {strides = array<i32>} : memref<2x8x1xf32, #tpu.memory_space<vmem>>, vector<1x8x1xf32>,
    %c0_37 = arith.constant 0 : index
    %c0_38 = arith.constant 0 : index
    %c0_39 = arith.constant 0 : index
    %c1 = arith.constant 1 : index
    %c0_40 = arith.constant 0 : index
    %43 = vector.load %arg4[%c0_37, %c0_38, %c0_39, %c1, %c0_40] : memref<1x8x1x2x32xf32, #tpu.memory_space<vmem>>, vector<1x8x1x1x32xf32>
    %44 = vector.shape_cast %43 : vector<1x8x1x1x32xf32> to vector<8x32xf32>
    %c0_41 = arith.constant 0 : index
    %c0_42 = arith.constant 0 : index
    %c0_43 = arith.constant 0 : index
    %c1_44 = arith.constant 1 : index
    %c0_45 = arith.constant 0 : index
    %45 = vector.load %arg5[%c0_41, %c0_42, %c0_43, %c1_44, %c0_45] : memref<1x8x1x2x32xf32, #tpu.memory_space<vmem>>, vector<1x8x1x1x32xf32>
    %46 = vector.shape_cast %45 : vector<1x8x1x1x32xf32> to vector<8x32xf32>
    %c0_46 = arith.constant 0 : index
    %c0_47 = arith.constant 0 : index
    %c0_48 = arith.constant 0 : index
    %c1_49 = arith.constant 1 : index
    %c0_50 = arith.constant 0 : index
    %47 = vector.load %arg6[%c0_46, %c0_47, %c0_48, %c1_49, %c0_50] : memref<1x8x1x2x32xf32, #tpu.memory_space<vmem>>, vector<1x8x1x1x32xf32>
    %48 = vector.shape_cast %47 : vector<1x8x1x1x32xf32> to vector<8x32xf32>
    %cst_51 = arith.constant dense<0.000000e+00> : vector<8x8xf32>
    %49 = tpu.matmul %44, %46, %cst_51 {dimension_numbers = #tpu.dot_dimension_numbers<[1], [1], [0], [0], [0, 0, 1, 0], [], []>} : vector<8x32xf32>, vector<8x32xf32>, vector<8x8xf32> -> vector<8x8xf32>
    %cst_52 = arith.constant 0.176776692 : f32
    %50 = vector.broadcast %cst_52 : f32 to vector<8x8xf32>
    %51 = arith.mulf %49, %50 : vector<8x8xf32>
    %c1_53 = arith.constant 1 : index
    %c0_54 = arith.constant 0 : index
    %c0_55 = arith.constant 0 : index
    %52 = vector.load %arg8[%c1_53, %c0_54, %c0_55] : memref<2x8x1xf32, #tpu.memory_space<vmem>>, vector<1x8x1xf32>
    %53 = vector.shape_cast %52 : vector<1x8x1xf32> to vector<8x1xf32>
    %cst_56 = arith.constant dense<0xFF800000> : vector<8xf32>
    %54 = vector.multi_reduction <maximumf>, %51, %cst_56 [1] : vector<8x8xf32> to vector<8xf32>
    %55 = vector.shape_cast %54 : vector<8xf32> to vector<8x1xf32>
    %56 = arith.maximumf %53, %55 : vector<8x1xf32>
    %57 = arith.subf %53, %56 : vector<8x1xf32>
    %58 = math.exp %57 : vector<8x1xf32>
    %59 = vector.broadcast %56 : vector<8x1xf32> to vector<8x8xf32>
    %60 = arith.subf %51, %59 : vector<8x8xf32>
    %61 = math.exp %60 : vector<8x8xf32>
    %c1_57 = arith.constant 1 : index
    %c0_58 = arith.constant 0 : index
    %c0_59 = arith.constant 0 : index
    %62 = vector.load %arg9[%c1_57, %c0_58, %c0_59] : memref<2x8x1xf32, #tpu.memory_space<vmem>>, vector<1x8x1xf32>
    %63 = vector.shape_cast %62 : vector<1x8x1xf32> to vector<8x1xf32>
    %64 = arith.mulf %58, %63 : vector<8x1xf32>
    %cst_60 = arith.constant dense<0.000000e+00> : vector<8xf32>
    %65 = vector.multi_reduction <add>, %61, %cst_60 [1] : vector<8x8xf32> to vector<8xf32>
    %66 = vector.shape_cast %65 : vector<8xf32> to vector<8x1xf32>
    %67 = arith.addf %64, %66 : vector<8x1xf32>
    %c1_61 = arith.constant 1 : index
    %c0_62 = arith.constant 0 : index
    %c0_63 = arith.constant 0 : index
    %68 = vector.load %arg9[%c1_61, %c0_62, %c0_63] : memref<2x8x1xf32, #tpu.memory_space<vmem>>, vector<1x8x1xf32>
    %69 = vector.shape_cast %68 : vector<1x8x1xf32> to vector<8x1xf32>
    %70 = vector.shape_cast %67 : vector<8x1xf32> to vector<1x8x1xf32>
    tpu.vector_store %arg9[%c1_61, %c0_62, %c0_63], %70 {strides = array<i32>} : memref<2x8x1xf32, #tpu.memory_space<vmem>>, vector<1x8x1xf32>,
    %c1_64 = arith.constant 1 : index
    %c0_65 = arith.constant 0 : index
    %c0_66 = arith.constant 0 : index
    %71 = vector.load %arg10[%c1_64, %c0_65, %c0_66] : memref<2x8x32xf32, #tpu.memory_space<vmem>>, vector<1x8x32xf32>
    %72 = vector.shape_cast %71 : vector<1x8x32xf32> to vector<8x32xf32>
    %73 = vector.broadcast %58 : vector<8x1xf32> to vector<8x32xf32>
    %74 = arith.mulf %73, %72 : vector<8x32xf32>
    %cst_67 = arith.constant dense<0.000000e+00> : vector<8x32xf32>
    %75 = tpu.matmul %61, %48, %cst_67 {dimension_numbers = #tpu.dot_dimension_numbers<[1], [0], [0], [1], [0, 0, 1, 1], [], []>} : vector<8x8xf32>, vector<8x32xf32>, vector<8x32xf32> -> vector<8x32xf32>
    %76 = arith.addf %74, %75 : vector<8x32xf32>
    %c1_68 = arith.constant 1 : index
    %c0_69 = arith.constant 0 : index
    %c0_70 = arith.constant 0 : index
    %77 = vector.load %arg10[%c1_68, %c0_69, %c0_70] : memref<2x8x32xf32, #tpu.memory_space<vmem>>, vector<1x8x32xf32>
    %78 = vector.shape_cast %77 : vector<1x8x32xf32> to vector<8x32xf32>
    %79 = vector.shape_cast %76 : vector<8x32xf32> to vector<1x8x32xf32>
    tpu.vector_store %arg10[%c1_68, %c0_69, %c0_70], %79 {strides = array<i32>} : memref<2x8x32xf32, #tpu.memory_space<vmem>>, vector<1x8x32xf32>,
    %c1_71 = arith.constant 1 : index
    %c0_72 = arith.constant 0 : index
    %c0_73 = arith.constant 0 : index
    %80 = vector.load %arg8[%c1_71, %c0_72, %c0_73] : memref<2x8x1xf32, #tpu.memory_space<vmem>>, vector<1x8x1xf32>
    %81 = vector.shape_cast %80 : vector<1x8x1xf32> to vector<8x1xf32>
    %82 = vector.shape_cast %56 : vector<8x1xf32> to vector<1x8x1xf32>
    tpu.vector_store %arg8[%c1_71, %c0_72, %c0_73], %82 {strides = array<i32>} : memref<2x8x1xf32, #tpu.memory_space<vmem>>, vector<1x8x1xf32>,
    %c0_i32_74 = arith.constant 0 : i32
    %83 = arith.cmpi eq, %arg3, %c0_i32_74 : i32
    %84 = arith.extui %83 : i1 to i32
    %c0_i32_75 = arith.constant 0 : i32
    %85 = arith.cmpi ne, %84, %c0_i32_75 : i32
    scf.if %85 {
      %c0_76 = arith.constant 0 : index
      %c0_77 = arith.constant 0 : index
      %c0_78 = arith.constant 0 : index
      %86 = vector.load %arg9[%c0_76, %c0_77, %c0_78] : memref<2x8x1xf32, #tpu.memory_space<vmem>>, vector<1x8x1xf32>
      %87 = vector.shape_cast %86 : vector<1x8x1xf32> to vector<8x1xf32>
      %88 = tpu.reciprocal %87 {approx = true} : vector<8x1xf32> -> vector<8x1xf32>
      %c0_79 = arith.constant 0 : index
      %c0_80 = arith.constant 0 : index
      %c0_81 = arith.constant 0 : index
      %89 = vector.load %arg10[%c0_79, %c0_80, %c0_81] : memref<2x8x32xf32, #tpu.memory_space<vmem>>, vector<1x8x32xf32>
      %90 = vector.shape_cast %89 : vector<1x8x32xf32> to vector<8x32xf32>
      %91 = vector.broadcast %88 : vector<8x1xf32> to vector<8x32xf32>
      %92 = arith.mulf %90, %91 : vector<8x32xf32>
      %c0_82 = arith.constant 0 : index
      %c0_83 = arith.constant 0 : index
      %c0_84 = arith.constant 0 : index
      %c0_85 = arith.constant 0 : index
      %93 = vector.load %arg7[%c0_82, %c0_83, %c0_84, %c0_85] : memref<1x8x2x32xf32, #tpu.memory_space<vmem>>, vector<1x8x1x32xf32>
      %94 = vector.shape_cast %93 : vector<1x8x1x32xf32> to vector<8x32xf32>
      %95 = vector.shape_cast %92 : vector<8x32xf32> to vector<1x8x1x32xf32>
      tpu.vector_store %arg7[%c0_82, %c0_83, %c0_84, %c0_85], %95 {strides = array<i32>} : memref<1x8x2x32xf32, #tpu.memory_space<vmem>>, vector<1x8x1x32xf32>,
      %c1_86 = arith.constant 1 : index
      %c0_87 = arith.constant 0 : index
      %c0_88 = arith.constant 0 : index
      %96 = vector.load %arg9[%c1_86, %c0_87, %c0_88] : memref<2x8x1xf32, #tpu.memory_space<vmem>>, vector<1x8x1xf32>
      %97 = vector.shape_cast %96 : vector<1x8x1xf32> to vector<8x1xf32>
      %98 = tpu.reciprocal %97 {approx = true} : vector<8x1xf32> -> vector<8x1xf32>
      %c1_89 = arith.constant 1 : index
      %c0_90 = arith.constant 0 : index
      %c0_91 = arith.constant 0 : index
      %99 = vector.load %arg10[%c1_89, %c0_90, %c0_91] : memref<2x8x32xf32, #tpu.memory_space<vmem>>, vector<1x8x32xf32>
      %100 = vector.shape_cast %99 : vector<1x8x32xf32> to vector<8x32xf32>
      %101 = vector.broadcast %98 : vector<8x1xf32> to vector<8x32xf32>
      %102 = arith.mulf %100, %101 : vector<8x32xf32>
      %c0_92 = arith.constant 0 : index
      %c0_93 = arith.constant 0 : index
      %c1_94 = arith.constant 1 : index
      %c0_95 = arith.constant 0 : index
      %103 = vector.load %arg7[%c0_92, %c0_93, %c1_94, %c0_95] : memref<1x8x2x32xf32, #tpu.memory_space<vmem>>, vector<1x8x1x32xf32>
      %104 = vector.shape_cast %103 : vector<1x8x1x32xf32> to vector<8x32xf32>
      %105 = vector.shape_cast %102 : vector<8x32xf32> to vector<1x8x1x32xf32>
      tpu.vector_store %arg7[%c0_92, %c0_93, %c1_94, %c0_95], %105 {strides = array<i32>} : memref<1x8x2x32xf32, #tpu.memory_space<vmem>>, vector<1x8x1x32xf32>,
    } else {
    }
    return
  }
  func.func @transform_0(%arg0: i32, %arg1: i32, %arg2: i32, %arg3: i32) -> (i32, i32, i32, i32, i32) {
    %c0_i32 = arith.constant 0 : i32
    %c0_i32_0 = arith.constant 0 : i32
    %c0_i32_1 = arith.constant 0 : i32
    return %arg0, %arg2, %c0_i32, %arg1, %c0_i32_0 : i32, i32, i32, i32, i32
  }
  func.func @transform_1(%arg0: i32, %arg1: i32, %arg2: i32, %arg3: i32) -> (i32, i32, i32, i32, i32) {
    %c1_i32 = arith.constant 1 : i32
    %c0_i32 = arith.constant 0 : i32
    %c0_i32_0 = arith.constant 0 : i32
    return %arg0, %arg3, %c1_i32, %arg1, %c0_i32 : i32, i32, i32, i32, i32
  }
  func.func @transform_2(%arg0: i32, %arg1: i32, %arg2: i32, %arg3: i32) -> (i32, i32, i32, i32, i32) {
    %c2_i32 = arith.constant 2 : i32
    %c0_i32 = arith.constant 0 : i32
    %c0_i32_0 = arith.constant 0 : i32
    return %arg0, %arg3, %c2_i32, %arg1, %c0_i32 : i32, i32, i32, i32, i32
  }
  func.func @transform_3(%arg0: i32, %arg1: i32, %arg2: i32, %arg3: i32) -> (i32, i32, i32, i32) {
    %c0_i32 = arith.constant 0 : i32
    %c0_i32_0 = arith.constant 0 : i32
    return %arg0, %arg2, %arg1, %c0_i32 : i32, i32, i32, i32
  }
}

</mosaic_0001>

<bundles_post_ra>
// kernel: tpu_custom_call.1
= control target key start
LH: loop header
LB: loop body
LE: loop exit
PB: predicated region body
PF: predicated region fallthrough
CT: control target
= control target key end

     0   :  { %s1606_s0 = inlined_call_operand.hbm [shape: f32[2,8,3,2,32], index: 0, kind: input, shape index: {}]   ;;  %s1607_s1 = inlined_call_operand.hbm [shape: f32[2,8,3,2,32], index: 1, kind: input, shape index: {}]   ;;  %s1608_s2 = inlined_call_operand.hbm [shape: f32[2,8,3,2,32], index: 2, kind: input, shape index: {}]   ;;  %s1609_s3 = inlined_call_operand.hbm [shape: f32[2,8,2,32], index: 3, kind: output, shape index: {}]  }
   0x1   :  { %1617 = sst [smem:[#allocation22_spill]] %s1607_s1 }
   0x2   :  { %8 = vsyncpa [#allocation6], 0 }
   0x3   :  { %10 = vsyncpa [#allocation6 + $0x1], 0 }
   0x4   :  { %11 = vsyncpa [#allocation9], 0 }
   0x5   :  { %13 = vsyncpa [#allocation9 + $0x1], 0 }
   0x6   :  { %14 = vsyncpa [#allocation7], 0 }
   0x7   :  { %16 = vsyncpa [#allocation7 + $0x1], 0  ;;  %s1265_s12 = smov 0   ;;  %s1267_s13 = smov 0  }
   0x8   :  { %s1269_s14 = smov 0   ;;  %s1271_s15 = smov 0  }
   0x9   :  { %s1273_s16 = smov 0   ;;  %s1275_s17 = smov 0  }
   0xa LB: > { %1618 = sst [smem:[#allocation15_spill]] %s1215_s12  ;;  %s1296_s18 = sadd.s32 4294967295, %s1235_s17   ;;  %s1235_s17 = sphi %s1275_s17, %s22_s17   ;;  %s1231_s16 = sphi %s1273_s16, %s1638_s16   ;;  %s1227_s15 = sphi %s1271_s15, %s1637_s15   ;;  %s1223_s14 = sphi %s1269_s14, %s1636_s14   ;;  %s1219_s13 = sphi %s1267_s13, %s1640_s13   ;;  %s1215_s12 = sphi %s1265_s12, %s1639_s12  }
   0xb   : > { %1619 = sst [smem:[#allocation16_spill]] %s1223_s14  ;;  %s937_s19 = sadd.s32 4294967294, %s1235_s17  }
   0xc   : > { %1620 = sst [smem:[#allocation17_spill]] %s1231_s16  ;;  %s48_s20 = sadd.s32 1, %s1231_s16 }
   0xd   : > { %1621 = sst [smem:[#allocation18_spill]] %s1235_s17  ;;  %s59_s21 = sadd.s32 1, %s1223_s14 }
   0xe   : > { %p50_p0 = scmp.ge.s32.totalorder %s48_s20, 2  ;;  %p66_p1 = scmp.ne.s32.totalorder %s1223_s14, %s1219_s13 }
   0xf   : > { %p67_p2 = scmp.eq.s32.totalorder %s1235_s17, 0  ;;  %p72_p3 = scmp.ne.s32.totalorder %s1219_s13, %s1215_s12 }
  0x10   : > { %s1642_s20 = smov (%p50_p0, %s48_s20), 0  ;;  %p73_p5 = scmp.eq.s32.totalorder %s1296_s18, 0 }
  0x11   : > { %1622 = sst [smem:[#allocation19_spill]] %s1642_s20  ;;  %p1308_p4 = por %p67_p2, %p66_p1 }
  0x12   : > { %s52_s23 = ssub.s32 %s1231_s16, %s1642_s20  ;;  %p160_p6 = scmp.eq.s32.totalorder %s1296_s18, 1 }
  0x13   : > { %p57_p7 = scmp.eq.s32.totalorder %s52_s23, 0  ;;  %p1316_p8 = por %p73_p5, %p72_p3 }
  0x14   : > { %p1320_p9 = por %p160_p6, %p66_p1  ;;  %p166_p10 = scmp.eq.s32.totalorder %s937_s19, 1 }
  0x15   : > { %s1325_s26 = scalar_select %p57_p7, %s1223_s14, %s59_s21  }
  0x16   : > { %p1327_p11 = por %p166_p10, %p72_p3  ;;  %p939_p12 = scmp.ge.s32.totalorder %s1235_s17, 2 }
  0x17   : > { %1626 = sst [smem:[#allocation20_spill]] %s1325_s26  ;;  %p986_p13 = scmp.lt.s32.totalorder %s1235_s17, 2 }
  0x18   : > { %s1627_s27 = scalar_select %p1327_p11, 1, 0 }
  0x19   : > { %s186_s28 = sand.u32 1, %s1223_s14   ;;  %s1337_s30 = smul.u32 48, %s1231_s16 }
  0x1a   : > { %1628 = sst [smem:[#allocation21_spill]] %s1627_s27  ;;  %s1334_s29 = sshll.u32 %s186_s28, 4 }
  0x1b   : > { %p1341_p0 = pnand %p986_p13, %p1308_p4  ;;  %s212_s5 = sand.u32 1, %s1235_s17  }
  0x1c   : > { %s1630_s1 = sld [smem:[#allocation22_spill]]  ;;  %s216_s9 = scalar_lea.vmem [#allocation8], %s1334_s29 }
  0x1d   : > { %s229_s10 = sshll.u32 %s216_s9, 4  ;;  %p946_p1 = scmp.ge.s32.totalorder %s1235_s17, 1  ;;  %s230_s10 = int_to_ptr.vmem [resolvable:$true] %s229_s10 }
  0x1e   : > { %p264_p2 = scmp.lt.s32.totalorder %s1235_s17, 3  ;;  %s213_s21 = scalar_lea.sflag [#allocation9], %s212_s5 }
  0x1f   : > { %s1237_s22 = smov 96   ;;  %s1238_s23 = smov 32  }
  0x20   : > { %s1239_s20 = smov 2   ;;  %p1355_p3 = pnand %p946_p1, %p264_p2 }
  0x21   : > { %s199_s9 = scalar_lea.hbm %s1606_s0, %s1337_s30  ;;  %s187_s5 = scalar_lea.sflag [#allocation6], %s186_s28 }
  0x22   : > { %s835_s8 = scalar_lea.hbm %s1630_s1, %s1337_s30  ;;  %s190_s1 = scalar_lea.vmem [#allocation5], %s1334_s29 }
  0x23   : > { %s836_s11 = scalar_lea.hbm %s835_s8, 2  ;;  %s202_s16 = sshll.u32 %s190_s1, 4  ;;  %s203_s16 = int_to_ptr.vmem [resolvable:$true] %s202_s16 }
  0x24   : > { %s227_s19 = sshll.u32 %s836_s11, 4  ;;  %s200_s11 = sshll.u32 %s199_s9, 4  ;;  %s228_s19 = int_to_ptr.hbm [resolvable:$true] %s227_s19  ;;  %s201_s11 = int_to_ptr.hbm [resolvable:$true] %s200_s11 }
  0x25   : > { %978 = dma.hbm_to_vmem [thread:$0]  (!%p1341_p0), %s228_s19, 256, %s230_s10, %s213_s21, %s1237_s22, %s1238_s23, %s1239_s20  }
  0x26   : > { %975 = dma.hbm_to_vmem [thread:$0]  (!%p1341_p0), %s201_s11, 256, %s203_s16, %s187_s5, %s1237_s22, %s1238_s23, %s1239_s20  }
  0x27   : > { %s845_s10 = scalar_lea.hbm %s1608_s2, %s1337_s30  ;;  %s243_s17 = scalar_lea.vmem [#allocation10], %s1334_s29 }
  0x28   : > { %s846_s19 = scalar_lea.hbm %s845_s10, 4  ;;  %s256_s27 = sshll.u32 %s243_s17, 4  ;;  %s257_s27 = int_to_ptr.vmem [resolvable:$true] %s256_s27 }
  0x29   : > { %s254_s12 = sshll.u32 %s846_s19, 4  ;;  %268 = sbr.rel (%p1355_p3) target bundleno = 726 (0x2d6), region = 32  ;;  %s255_s12 = int_to_ptr.hbm [resolvable:$true] %s254_s12 }
  0x2a   : > { %981 = dma.hbm_to_vmem [thread:$0]  (!%p1341_p0), %s255_s12, 256, %s257_s27, %s213_s21, %s1237_s22, %s1238_s23, %s1239_s20  }
  0x2b   : > { %s1376_s1 = sand.u32 (!%p1355_p3), 1, %s1219_s13  }
  0x2c   : > { %s1379_s16 = sshll.u32 (!%p1355_p3), %s1376_s1, 4  ;;  %s271_s14 = scalar_lea.sflag (!%p1355_p3), [#allocation6], %s1376_s1 }
  0x2d   : > { %s1383_s26 = scalar_lea.vmem (!%p1355_p3), [#allocation5], %s1379_s16 }
  0x2e   : > { %1202 = dma.done.wait (%p1316_p8), %s271_s14, 256  }
  0x2f   : > { %1204 = vsyncadd (%p1316_p8), %s271_s14, 4294967040  ;;  %s280_s12 = sand.u32 1, %s1296_s18   ;;  %s1391_s20 = scalar_lea.vmem [#allocation8], %s1379_s16 }
  0x30   : > { %s281_s17 = scalar_lea.sflag [#allocation9], %s280_s12 }
  0x31   : > { %1206 = dma.done.wait (%p1316_p8), %s281_s17, 512  }
  0x32   : > { %1208 = vsyncadd (%p1316_p8), %s281_s17, 4294966784  ;;  %vm341_vm0 = vcmask 261120   ;;  %v1240_v0 = vmov 0.0   ;;  %vm377_vm1 = vcmask 1041409   ;;  %vm380_vm2 = vcmask 1042434   ;;  %s1488_s18 = scalar_lea.vmem [#allocation10], %s1379_s16 }
  0x33   : > { %342 = vst.msk [vmem:[#allocation4] sm:$0xff] %vm341_vm0, %v1240_v0  ;;  %vm383_vm3 = vcmask 1043459   ;;  %vm386_vm4 = vcmask 1044484   ;;  %vm389_vm5 = vcmask 1045509   ;;  %vm392_vm6 = vcmask 1046534   ;;  %s1533_s24 = scalar_lea.vmem [#allocation11], %s1379_s16 }
  0x34   : > { %343 = vst.msk [vmem:[#allocation4 + $0x8] sm:$0xff] %vm341_vm0, %v1240_v0  ;;  %v534_v1 = vld [vmem:[%s1391_s20 + $0x1] sm:$0x1]  ;;  %v535_v2 = vld [vmem:[%s1391_s20 + $0x3] sm:$0x1]  ;;  %vm395_vm7 = vcmask 1047559  }
  0x35   : > { %v536_v3 = vld [vmem:[%s1391_s20 + $0x5] sm:$0x1]  ;;  %v537_v4 = vld [vmem:[%s1391_s20 + $0x7] sm:$0x1]  ;;  %v538_v5 = vld [vmem:[%s1391_s20 + $0x9] sm:$0x1] }
  0x36   : > { %v539_v6 = vld [vmem:[%s1391_s20 + $0xb] sm:$0x1]  ;;  %v540_v7 = vld [vmem:[%s1391_s20 + $0xd] sm:$0x1]  ;;  %v541_v8 = vld [vmem:[%s1391_s20 + $0xf] sm:$0x1] }
  0x37   : > { %v580_v9 = vrot.slane %v535_v2, 7  ;;  %v582_v10 = vrot.slane %v536_v3, 6  ;;  %v584_v11 = vrot.slane %v537_v4, 5  ;;  %v586_v12 = vrot.slane %v538_v5, 4  ;;  %v526_v14 = vld [vmem:[%s1383_s26 + $0x1] sm:$0x1] }
  0x38   : > { %v588_v13 = vrot.slane %v539_v6, 3  ;;  %v590_v16 = vrot.slane %v540_v7, 2  ;;  %v592_v17 = vrot.slane %v541_v8, 1  ;;  %v527_v18 = vld [vmem:[%s1383_s26 + $0x3] sm:$0x1]  ;;  %vm336_vm8 = vcmask 7168  }
  0x39   : > { %v581_v15 = vsel %vm377_vm1, %v580_v9, %v534_v1  ;;  %v528_v19 = vld [vmem:[%s1383_s26 + $0x5] sm:$0x1]  ;;  %v529_v21 = vld [vmem:[%s1383_s26 + $0x7] sm:$0x1]  ;;  %v530_v22 = vld [vmem:[%s1383_s26 + $0x9] sm:$0x1] }
  0x3a   : > { %v583_v20 = vsel %vm380_vm2, %v582_v10, %v581_v15  ;;  %v531_v23 = vld [vmem:[%s1383_s26 + $0xb] sm:$0x1]  ;;  %v532_v25 = vld [vmem:[%s1383_s26 + $0xd] sm:$0x1]  ;;  %v533_v26 = vld [vmem:[%s1383_s26 + $0xf] sm:$0x1] }
  0x3b   : > { %v585_v24 = vsel %vm383_vm3, %v584_v11, %v583_v20  ;;  %v558_v27 = vrot.slane %v527_v18, 7  ;;  %v560_v28 = vrot.slane %v528_v19, 6  ;;  %v562_v30 = vrot.slane %v529_v21, 5  ;;  %v352_v33 = vld [vmem:[%s1391_s20] sm:$0x1]  ;;  %339 = vst.msk [vmem:[#allocation3] sm:$0xff] %vm336_vm8, %v1240_v0 }
  0x3c   : > { %v587_v29 = vsel %vm386_vm4, %v586_v12, %v585_v24  ;;  %v564_v31 = vrot.slane %v530_v22, 4  ;;  %v566_v32 = vrot.slane %v531_v23, 3  ;;  %v568_v36 = vrot.slane %v532_v25, 2  ;;  %v353_v38 = vld [vmem:[%s1391_s20 + $0x2] sm:$0x1]  ;;  %340 = vst.msk [vmem:[#allocation3 + $0x8] sm:$0xff] %vm336_vm8, %v1240_v0 }
  0x3d   : > { %v589_v34 = vsel %vm389_vm5, %v588_v13, %v587_v29  ;;  %v559_v35 = vsel %vm377_vm1, %v558_v27, %v526_v14  ;;  %v570_v37 = vrot.slane %v533_v26, 1  ;;  %v354_v39 = vld [vmem:[%s1391_s20 + $0x4] sm:$0x1]  ;;  %v355_v42 = vld [vmem:[%s1391_s20 + $0x6] sm:$0x1]  ;;  %v405_v49 = vrot.slane %v353_v38, 7 }
  0x3e   : > { %v591_v40 = vsel %vm392_vm6, %v590_v16, %v589_v34  ;;  %v561_v41 = vsel %vm380_vm2, %v560_v28, %v559_v35  ;;  %v356_v43 = vld [vmem:[%s1391_s20 + $0x8] sm:$0x1]  ;;  %v357_v44 = vld [vmem:[%s1391_s20 + $0xa] sm:$0x1]  ;;  %v358_v47 = vld [vmem:[%s1391_s20 + $0xc] sm:$0x1] }
  0x3f   : > { %v593_v45 = vsel %vm395_vm7, %v592_v17, %v591_v40  ;;  %v563_v46 = vsel %vm383_vm3, %v562_v30, %v561_v41  ;;  %v359_v48 = vld [vmem:[%s1391_s20 + $0xe] sm:$0x1]  ;;  %v407_v50 = vrot.slane %v354_v39, 6  ;;  %v409_v52 = vrot.slane %v355_v42, 5  ;;  %v344_v55 = vld [vmem:[%s1383_s26] sm:$0x1] }
  0x40   : > { %954 = vmatpush.xpose.msk.msra.mxu2 %vm341_vm0, %v593_v45  ;;  %v565_v51 = vsel %vm386_vm4, %v564_v31, %v563_v46  ;;  %v411_v53 = vrot.slane %v356_v43, 4  ;;  %v413_v54 = vrot.slane %v357_v44, 3  ;;  %v406_v57 = vsel %vm377_vm1, %v405_v49, %v352_v33  ;;  %v345_v60 = vld [vmem:[%s1383_s26 + $0x2] sm:$0x1]  ;;  %v346_v61 = vld [vmem:[%s1383_s26 + $0x4] sm:$0x1] }
  0x41   : > { %v567_v56 = vsel %vm389_vm5, %v566_v32, %v565_v51  ;;  %v415_v58 = vrot.slane %v358_v47, 2  ;;  %v417_v59 = vrot.slane %v359_v48, 1  ;;  %v408_v63 = vsel %vm380_vm2, %v407_v50, %v406_v57  ;;  %v347_v1 = vld [vmem:[%s1383_s26 + $0x6] sm:$0x1]  ;;  %v348_v2 = vld [vmem:[%s1383_s26 + $0x8] sm:$0x1] }
  0x42   : > { %v569_v62 = vsel %vm392_vm6, %v568_v36, %v567_v56  ;;  %v349_v3 = vld [vmem:[%s1383_s26 + $0xa] sm:$0x1]  ;;  %v410_v5 = vsel %vm383_vm3, %v409_v52, %v408_v63  ;;  %v350_v6 = vld [vmem:[%s1383_s26 + $0xc] sm:$0x1]  ;;  %v376_v7 = vrot.slane %v345_v60, 7  ;;  %v379_v8 = vrot.slane %v346_v61, 6 }
  0x43   : > { %v571_v4 = vsel %vm395_vm7, %v570_v37, %v569_v62  ;;  %v412_v9 = vsel %vm386_vm4, %v411_v53, %v410_v5  ;;  %v351_v10 = vld [vmem:[%s1383_s26 + $0xe] sm:$0x1]  ;;  %v382_v11 = vrot.slane %v347_v1, 5  ;;  %v385_v12 = vrot.slane %v348_v2, 4  ;;  %v543_v45 = vld [vmem:[%s1488_s18 + $0x3] sm:$0x1] }
  0x44   : > { %955 = vmatmul.msk.f32.vlgmr.msra.gmra.mxu2 %vm341_vm0, %v571_v4  ;;  %v414_v13 = vsel %vm389_vm5, %v413_v54, %v412_v9  ;;  %v378_v14 = vsel %vm377_vm1, %v376_v7, %v344_v55  ;;  %v388_v15 = vrot.slane %v349_v3, 3  ;;  %v391_v18 = vrot.slane %v350_v6, 2  ;;  %v544_v46 = vld [vmem:[%s1488_s18 + $0x5] sm:$0x1]  ;;  %v542_v48 = vld [vmem:[%s1488_s18 + $0x1] sm:$0x1] }
  0x45   : > { %v416_v16 = vsel %vm392_vm6, %v415_v58, %v414_v13  ;;  %v381_v17 = vsel %vm380_vm2, %v379_v8, %v378_v14  ;;  %v394_v21 = vrot.slane %v351_v10, 1  ;;  %v1241_v26 = vmov -inf   ;;  %v545_v49 = vld [vmem:[%s1488_s18 + $0x7] sm:$0x1]  ;;  %v546_v51 = vld [vmem:[%s1488_s18 + $0x9] sm:$0x1] }
  0x46   : > { %v418_v19 = vsel %vm395_vm7, %v417_v59, %v416_v16  ;;  %v384_v20 = vsel %vm383_vm3, %v382_v11, %v381_v17  ;;  %338 = vst.msk [vmem:[#allocation2 + $0x8] sm:$0xff] %vm336_vm8, %v1241_v26  ;;  %vm446_vm9 = vcmask 64512   ;;  %v1242_v33 = vmov 0   ;;  %v547_v54 = vld [vmem:[%s1488_s18 + $0xb] sm:$0x1]  ;;  %s962_s27 = sshll.u32 %s1227_s15, 4 }
  0x47   : > { %951 = vmatpush.xpose.msk.msra.mxu0 %vm341_vm0, %v418_v19  ;;  %v387_v22 = vsel %vm386_vm4, %v385_v12, %v384_v20  ;;  %337 = vst.msk [vmem:[#allocation2] sm:$0xff] %vm336_vm8, %v1241_v26  ;;  %1044 = vset.pattern.permute.xlu1 %v1242_v33  ;;  %v660_v47 = vrot.slane %v543_v45, 7  ;;  %v662_v50 = vrot.slane %v544_v46, 6  ;;  %v664_v53 = vrot.slane %v545_v49, 5  ;;  %v548_v57 = vld [vmem:[%s1488_s18 + $0xd] sm:$0x1]  ;;  %s784_s30 = scalar_lea.hbm %s1609_s3, %s962_s27 }
  0x48   : > { %v390_v23 = vsel %vm389_vm5, %v388_v15, %v387_v22  ;;  %1045 = vset.pattern.permute.xlu0 %v1242_v33  ;;  %1046 = vset.pattern.permute.xlu2 %v1242_v33  ;;  %v666_v56 = vrot.slane %v546_v51, 4  ;;  %v668_v59 = vrot.slane %v547_v54, 3  ;;  %v549_v60 = vld [vmem:[%s1488_s18 + $0xf] sm:$0x1]  ;;  %v670_v62 = vrot.slane %v548_v57, 2  ;;  %s785_s15 = sshll.u32 %s1533_s24, 4  ;;  %s786_s15 = int_to_ptr.vmem [resolvable:$true] %s785_s15 }
  0x49   : > { %v393_v24 = vsel %vm392_vm6, %v391_v18, %v390_v23  ;;  %v661_v52 = vsel %vm377_vm1, %v660_v47, %v542_v48  ;;  %v672_v1 = vrot.slane %v549_v60, 1  ;;  %v361_v3 = vld [vmem:[%s1488_s18 + $0x2] sm:$0x1]  ;;  %v362_v5 = vld [vmem:[%s1488_s18 + $0x4] sm:$0x1]  ;;  %vm728_vm10 = vcmask 253952  }
  0x4a   : > { %v396_v25 = vsel %vm395_vm7, %v394_v21, %v393_v24  ;;  %v663_v55 = vsel %vm380_vm2, %v662_v50, %v661_v52  ;;  %v485_v6 = vrot.slane %v361_v3, 7  ;;  %v360_v7 = vld [vmem:[%s1488_s18] sm:$0x1]  ;;  %v363_v8 = vld [vmem:[%s1488_s18 + $0x6] sm:$0x1]  ;;  %v487_v9 = vrot.slane %v362_v5, 6 }
  0x4b   : > { %952 = vmatmul.msk.f32.vlgmr.msra.gmra.mxu0 %vm341_vm0, %v396_v25  ;;  %v665_v58 = vsel %vm383_vm3, %v664_v53, %v663_v55  ;;  %v364_v10 = vld [vmem:[%s1488_s18 + $0x8] sm:$0x1]  ;;  %v489_v12 = vrot.slane %v363_v8, 5  ;;  %v365_v13 = vld [vmem:[%s1488_s18 + $0xa] sm:$0x1]  ;;  %s787_s4 = sshll.u32 %s784_s30, 4  ;;  %s788_s4 = int_to_ptr.hbm [resolvable:$true] %s787_s4 }
  0x4c   : > { %v667_v61 = vsel %vm386_vm4, %v666_v56, %v665_v58  ;;  %v486_v11 = vsel %vm377_vm1, %v485_v6, %v360_v7  ;;  %v491_v15 = vrot.slane %v364_v10, 4  ;;  %v366_v16 = vld [vmem:[%s1488_s18 + $0xc] sm:$0x1]  ;;  %v493_v18 = vrot.slane %v365_v13, 3  ;;  %v367_v19 = vld [vmem:[%s1488_s18 + $0xe] sm:$0x1] }
  0x4d   : > { %v620_v0 = vld [vmem:[#allocation2 + $0x8] sm:$0xff]  ;;  %v669_v63 = vsel %vm389_vm5, %v668_v59, %v667_v61  ;;  %v488_v14 = vsel %vm380_vm2, %v487_v9, %v486_v11  ;;  %v495_v21 = vrot.slane %v366_v16, 2  ;;  %v497_v23 = vrot.slane %v367_v19, 1  ;;  %s770_s21 = scalar_lea.sflag [#allocation7], %s1376_s1  ;;  %s1163_s22 = sshra.s32 %s788_s4, 4  ;;  %s1164_s22 = int_to_ptr.hbm [resolvable:$true] %s1163_s22 }
  0x4e   : > { %v445_v37 = vld [vmem:[#allocation2] sm:$0xff]  ;;  %v671_v2 = vsel %vm392_vm6, %v670_v62, %v669_v63  ;;  %v490_v17 = vsel %vm383_vm3, %v489_v12, %v488_v14  ;;  %s1165_s23 = scalar_lea.hbm %s1164_s22, 16  ;;  %s1169_s8 = scalar_lea.hbm %s1609_s3, 32 }
  0x4f   : > { %v673_v4 = vsel %vm395_vm7, %v672_v1, %v671_v2  ;;  %v492_v20 = vsel %vm386_vm4, %v491_v15, %v490_v17  ;;  %p1166_p4 = scmp.ne.s32.totalorder %s1164_s22, %s1165_s23  ;;  %p1170_p7 = scmp.lt.s32.totalorder %s1164_s22, %s1609_s3 }
  0x50   : > { %693 = vmatpush.msra.mxu3 %v673_v4  ;;  %v494_v22 = vsel %vm389_vm5, %v493_v18, %v492_v20  ;;  %p1171_p8 = scmp.lt.s32.totalorder %s1169_s8, %s1165_s23 }
  0x51   : > { %v496_v24 = vsel %vm392_vm6, %v495_v21, %v494_v22  ;;  %p1167_p5 = pnand %p1166_p4, %p1320_p9 }
  0x52   : > { %v498_v25 = vsel %vm395_vm7, %v497_v23, %v496_v24  ;;  %p1172_p10 = por %p1171_p8, %p1170_p7 }
  0x53   : > { %518 = vmatpush.msra.mxu1 %v498_v25  ;;  %p1168_p6 = pneg %p1167_p5 }
  0x55   : > { %p1173_p13 = pnand %p1172_p10, %p1168_p6 }
  0xc7   : > { %v615_v27 = vpop.f32.mrf.mxu2 }
  0xc8   : > { %v1471_v28 = vmul.f32 0.17677669, %v615_v27  ;;  %v441_v29 = vpop.f32.mrf.mxu0 }
  0xc9   : > { %v1475_v31 = vmul.f32 0.17677669, %v441_v29 }
  0xca   : > { %v621_v30 = vsel %vm446_vm9, %v1471_v28, -inf }
  0xcb   : > { %622 = vmax.xlane.f32.xlu0 %v621_v30  ;;  %v447_v32 = vsel %vm446_vm9, %v1475_v31, -inf }
  0xd3   : > { %448 = vmax.xlane.f32.xlu0 %v447_v32 }
 0x13e   : > { %v623_v34 = vpop.xlane.xlu0 %622 }
 0x13f   : > { %v624_v35 = vmax.f32 %v620_v0, %v623_v34 }
 0x141   : > { %700 = vst.msk [vmem:[#allocation2 + $0x8] sm:$0xff] %vm336_vm8, %v624_v35  ;;  %630 = vperm.xlu1 %1044, %v624_v35   ;;  %v625_v36 = vsub.f32 %v620_v0, %v624_v35 }
 0x143   : > { %v626_v38 = vmul.f32 1.442695, %v625_v36 }
 0x145   : > { %1047 = vpow2.f32 %v626_v38 }
 0x146   : > { %v449_v39 = vpop.xlane.xlu0 %448 }
 0x147   : > { %v450_v40 = vmax.f32 %v445_v37, %v449_v39 }
 0x149   : > { %v451_v41 = vsub.f32 %v445_v37, %v450_v40  ;;  %525 = vst.msk [vmem:[#allocation2] sm:$0xff] %vm336_vm8, %v450_v40  ;;  %456 = vperm.xlu1 %1044, %v450_v40  }
 0x14b   : > { %v452_v42 = vmul.f32 1.442695, %v451_v41  ;;  %v1481_v43 = vpop.eup %1047  ;;  %v637_v41 = vld [vmem:[#allocation3 + $0x8] sm:$0xff] }
 0x14c   : > { %v638_v48 = vmul.f32 %v1481_v43, %v637_v41 }
 0x14d   : > { %1049 = vpow2.f32 %v452_v42  ;;  %v470_v42 = vld [vmem:[#allocation4] sm:$0xff] }
 0x151   : > { %648 = vperm.xlu1 %1044, %v1481_v43  }
 0x153   : > { %v1484_v44 = vpop.eup %1049 }
 0x154   : > { %473 = vperm.xlu0 %1045, %v1484_v44  }
 0x1b3   : > { %v631_v26 = vpop.permute.xlu1 %630 }
 0x1b4   : > { %v633_v27 = vsub.f32 %v1471_v28, %v631_v26  ;;  %v462_v28 = vld [vmem:[#allocation3] sm:$0xff] }
 0x1b5   : > { %v463_v37 = vmul.f32 %v1484_v44, %v462_v28 }
 0x1b6   : > { %v634_v29 = vmul.f32 1.442695, %v633_v27 }
 0x1b8   : > { %1051 = vpow2.f32 %v634_v29 }
 0x1bb   : > { %v457_v30 = vpop.permute.xlu1 %456 }
 0x1bc   : > { %v459_v32 = vsub.f32 %v1475_v31, %v457_v30  ;;  %v645_v31 = vld [vmem:[#allocation4 + $0x8] sm:$0xff] }
 0x1be   : > { %v1052_v33 = vpop.eup %1051  ;;  %v460_v0 = vmul.f32 1.442695, %v459_v32 }
 0x1bf   : > { %956 = vmatmul.msk.f32.vlgmr.msra.gmra.mxu3 %vm446_vm9, %v1052_v33  ;;  %v639_v36 = vsel %vm446_vm9, %v1052_v33, 0.0 }
 0x1c0   : > { %1053 = vpow2.f32 %v460_v0 }
 0x1c3   : > { %v649_v40 = vpop.permute.xlu1 %648 }
 0x1c4   : > { %v651_v46 = vmul.f32 %v649_v40, %v645_v31 }
 0x1c6   : > { %v1054_v34 = vpop.eup %1053  ;;  %v474_v45 = vpop.permute.xlu0 %473 }
 0x1c7   : > { %953 = vmatmul.msk.f32.vlgmr.msra.gmra.mxu1 %vm446_vm9, %v1054_v34  ;;  %v464_v35 = vsel %vm446_vm9, %v1054_v34, 0.0  ;;  %v476_v49 = vmul.f32 %v474_v45, %v470_v42 }
 0x1c8   : > { %465 = vadd.xlane.f32.xlu2 %v464_v35 }
 0x1d0   : > { %640 = vadd.xlane.f32.xlu2 %v639_v36 }
 0x23b   : > { %v466_v38 = vpop.xlane.xlu2 %465 }
 0x23c   : > { %v467_v39 = vadd.f32 %v466_v38, %v463_v37 }
 0x23e   : > { %469 = vst.msk [vmem:[#allocation3] sm:$0xff] %vm336_vm8, %v467_v39 }
 0x242   : > { %v695_v47 = vpop.f32.mrf.mxu3 }
 0x243   : > { %v698_v50 = vadd.f32 %v695_v47, %v651_v46  ;;  %v641_v51 = vpop.xlane.xlu2 %640 }
 0x244   : > { %v642_v52 = vadd.f32 %v641_v51, %v638_v48  ;;  %v520_v53 = vpop.f32.mrf.mxu1 }
 0x245   : > { %699 = vst.msk [vmem:[#allocation4 + $0x8] sm:$0xff] %vm341_vm0, %v698_v50  ;;  %v523_v44 = vadd.f32 %v520_v53, %v476_v49  ;;  %v704_v54 = vld [vmem:[#allocation3] sm:$0xff] }
 0x246   : > { %643 = vst.msk [vmem:[#allocation3 + $0x8] sm:$0xff] %vm336_vm8, %v642_v52  ;;  %1055 = vrcp.f32 %v704_v54 }
 0x247   : > { %524 = vst.msk [vmem:[#allocation4] sm:$0xff] %vm341_vm0, %v523_v44 }
 0x24c   : > { %v1056_v55 = vpop.eup %1055  ;;  %v739_v4 = vld [vmem:[#allocation4 + $0x8] sm:$0xff] }
 0x24d   : > { %709 = vperm.xlu2 %1046, %v1056_v55   ;;  %v737_v56 = vld [vmem:[#allocation3 + $0x8] sm:$0xff] }
 0x24e   : > { %1057 = vrcp.f32 %v737_v56  ;;  %v706_v57 = vld [vmem:[#allocation4] sm:$0xff] }
 0x254   : > { %v1058_v43 = vpop.eup %1057 }
 0x255   : > { %742 = vperm.xlu1 %1044, %v1058_v43  }
 0x2a7   : > { %v710_v58 = vpop.permute.xlu2 %709 }
 0x2a8   : > { %v712_v59 = vmul.f32 %v710_v58, %v706_v57 }
 0x2aa   : > { %v714_v60 = vrot.slane %v712_v59, 1  ;;  %v715_v61 = vrot.slane %v712_v59, 2  ;;  %v716_v62 = vrot.slane %v712_v59, 3  ;;  %729 = vst.msk [vmem:[%s1533_s24] sm:$0x1] %vm728_vm10, %v712_v59  ;;  %v717_v63 = vrot.slane %v712_v59, 4 }
 0x2ab   : > { %v718_v1 = vrot.slane %v712_v59, 5  ;;  %v719_v2 = vrot.slane %v712_v59, 6  ;;  %v720_v3 = vrot.slane %v712_v59, 7 }
 0x2ac   : > { %730 = vst.msk [vmem:[%s1533_s24 + $0x2] sm:$0x1] %vm728_vm10, %v714_v60 }
 0x2ad   : > { %731 = vst.msk [vmem:[%s1533_s24 + $0x4] sm:$0x1] %vm728_vm10, %v715_v61 }
 0x2ae   : > { %732 = vst.msk [vmem:[%s1533_s24 + $0x6] sm:$0x1] %vm728_vm10, %v716_v62 }
 0x2af   : > { %733 = vst.msk [vmem:[%s1533_s24 + $0x8] sm:$0x1] %vm728_vm10, %v717_v63 }
 0x2b0   : > { %734 = vst.msk [vmem:[%s1533_s24 + $0xa] sm:$0x1] %vm728_vm10, %v718_v1 }
 0x2b1   : > { %735 = vst.msk [vmem:[%s1533_s24 + $0xc] sm:$0x1] %vm728_vm10, %v719_v2 }
 0x2b2   : > { %736 = vst.msk [vmem:[%s1533_s24 + $0xe] sm:$0x1] %vm728_vm10, %v720_v3 }
 0x2c7   : > { %v743_v5 = vpop.permute.xlu1 %742 }
 0x2c8   : > { %v745_v6 = vmul.f32 %v743_v5, %v739_v4 }
 0x2ca   : > { %v747_v7 = vrot.slane %v745_v6, 1  ;;  %v748_v8 = vrot.slane %v745_v6, 2  ;;  %v749_v9 = vrot.slane %v745_v6, 3  ;;  %761 = vst.msk [vmem:[%s1533_s24 + $0x1] sm:$0x1] %vm728_vm10, %v745_v6  ;;  %v750_v10 = vrot.slane %v745_v6, 4 }
 0x2cb   : > { %v751_v11 = vrot.slane %v745_v6, 5  ;;  %v752_v12 = vrot.slane %v745_v6, 6  ;;  %v753_v13 = vrot.slane %v745_v6, 7 }
 0x2cc   : > { %762 = vst.msk [vmem:[%s1533_s24 + $0x3] sm:$0x1] %vm728_vm10, %v747_v7 }
 0x2cd   : > { %763 = vst.msk [vmem:[%s1533_s24 + $0x5] sm:$0x1] %vm728_vm10, %v748_v8 }
 0x2ce   : > { %764 = vst.msk [vmem:[%s1533_s24 + $0x7] sm:$0x1] %vm728_vm10, %v749_v9 }
 0x2cf   : > { %765 = vst.msk [vmem:[%s1533_s24 + $0x9] sm:$0x1] %vm728_vm10, %v750_v10 }
 0x2d0   : > { %766 = vst.msk [vmem:[%s1533_s24 + $0xb] sm:$0x1] %vm728_vm10, %v751_v11 }
 0x2d1   : > { %767 = vst.msk [vmem:[%s1533_s24 + $0xd] sm:$0x1] %vm728_vm10, %v752_v12 }
 0x2d2   : > { %768 = vst.msk [vmem:[%s1533_s24 + $0xf] sm:$0x1] %vm728_vm10, %v753_v13 }
 0x2d3   : > { %1176 = shalt.err (!%p1173_p13)
}
 0x2d4   : > { %s1243_s5 = smov 32   ;;  %s1244_s10 = smov 2  }
 0x2d5   : > { %970 = dma.vmem_to_hbm [thread:$0]  (%p1320_p9), %s786_s15, 256, %s788_s4, %s770_s21, %s1243_s5, %s1243_s5, %s1244_s10  }
 0x2d6 PF: > { %s1632_s19 = sld [smem:[#allocation15_spill]]  ;;  %p983_p0 = pnand %p939_p12, %p1327_p11 }
 0x2d7   : > { %s1634_s16 = sld [smem:[#allocation18_spill]] }
 0x2d8   : > { %p984_p1 = pneg %p983_p0 }
 0x2dc   : > { %s802_s14 = sand.u32 1, %s1632_s19  }
 0x2dd   : > { %s803_s26 = scalar_lea.sflag [#allocation7], %s802_s14 }
 0x2de   : > { %1210 = dma.done.wait (%p984_p1), %s803_s26, 256  }
 0x2df   : > { %1212 = vsyncadd (%p984_p1), %s803_s26, 4294967040  ;;  %s22_s17 = sadd.s32 1, %s1634_s16   ;;  %s1635_s20 = sld [smem:[#allocation16_spill]] }
 0x2e0   : > { %p19_p2 = scmp.ge.s32.totalorder %s22_s17, 4   ;;  %s1636_s14 = sld [smem:[#allocation20_spill]] }
 0x2e1   : > { %s1637_s15 = sld [smem:[#allocation17_spill]]  ;;  %s1639_s12 = smov %s1219_s13 }
 0x2e2   : > { %s1638_s16 = sld [smem:[#allocation19_spill]]  ;;  %21 = sbr.rel (!%p19_p2) target bundleno = 10 (0xa), region = 112 }
 0x2e5   : > { %s1640_s13 = smov %s1635_s20 }
 0x2e7   :  { %809 = vsyncpa [#allocation6], 1 }
 0x2e8   :  { %811 = vsyncpa [#allocation6 + $0x1], 1 }
 0x2e9   :  { %812 = vsyncpa [#allocation9], 1 }
 0x2ea   :  { %814 = vsyncpa [#allocation9 + $0x1], 1 }
 0x2eb   :  { %815 = vsyncpa [#allocation7], 1 }
 0x2ec   :  { %817 = vsyncpa [#allocation7 + $0x1], 1 }

</bundles_post_ra>
